<compile_context>
chip_gen: v6e
topology: v6e:2x2x1
jax: 0.10.0
libtpu: 0.0.40
codegen_flags: <defaults>
</compile_context>

<pallas_src>
import functools
import math

import jax
import jax.numpy as jnp
import numpy as np
from jax.experimental import pallas as pl
from jax.experimental.pallas import tpu as pltpu


def _level_params(H, W, out_pool_size):
    """Replicates the MaxPool2d hyper-parameters built in __init__."""
    levels = []
    for n in out_pool_size:
        kh = int(math.ceil(H / n))
        kw = int(math.ceil(W / n))
        ph = (kh * n - H + 1) // 2
        pw = (kw * n - W + 1) // 2
        # PyTorch MaxPool2d output size (ceil_mode=False), stride == kernel.
        LH = (H + 2 * ph - kh) // kh + 1
        LW = (W + 2 * pw - kw) // kw + 1
        # Guard: no window may lie entirely in padding (PyTorch rejects pad > k/2).
        for oh in range(LH):
            hs, he = max(oh * kh - ph, 0), min(oh * kh - ph + kh, H)
            assert he > hs, f"empty H window at level n={n}, oh={oh}"
        for ow in range(LW):
            ws, we = max(ow * kw - pw, 0), min(ow * kw - pw + kw, W)
            assert we > ws, f"empty W window at level n={n}, ow={ow}"
        levels.append((kh, kw, ph, pw, LH, LW))
    return levels


def _choose_rows_block(total_rows, row_bytes, *, target_bytes=4 << 20):
    """(n, c) rows per grid step.

    Multiple of 128 (full vreg lanes after the in-kernel transpose), ~4 MiB
    input blocks, and >=2 grid steps when there is enough work so both v7x
    TensorCores get multi-MiB steps.  For tiny inputs (total_rows <= 128) a
    single partially-filled block is unavoidable and irrelevant.
    """
    if total_rows <= 128:
        return int(total_rows)
    r = max(128, (int(target_bytes // max(row_bytes, 1)) // 128) * 128)
    if total_rows >= 256:
        half = ((total_rows + 1) // 2 + 127) // 128 * 128
        r = min(r, half)                       # keep >=2 grid steps (megacore)
    r = min(r, (total_rows + 127) // 128 * 128)
    return int(r)


def _vmem_limit_bytes(in_block_bytes, out_block_bytes):
    """Explicit scoped-VMEM budget (generation-aware; v7x has 64 MiB / TC)."""
    try:
        cap = pltpu.get_tpu_info().vmem_capacity_bytes
    except Exception:                           # conservative fallback
        cap = 64 << 20
    # double-buffered in/out blocks + transposed copy + pooling temporaries.
    want = 6 * in_block_bytes + 2 * out_block_bytes + (4 << 20)
    return int(min(max(want, 32 << 20), cap - (8 << 20)))


def _make_kernel(levels, H, W):
    """Kernel over one block of R (n, c) spatial maps.

    x_ref: (R, H*W)  -- rows are (n, c) maps, lanes the flat h*W + w index.
    o_ref: (P, R)    -- pooled cells (levels concatenated), lanes = (n, c).
    """

    def kernel(x_ref, o_ref):
        R = x_ref.shape[0]
        xb = x_ref[...]                                  # (R, H*W)
        # Single in-VMEM relayout: (n, c) onto the 128-lane axis.  XLU work,
        # hidden under the HBM DMA for this memory-bound kernel.
        t = jnp.transpose(xb).reshape(H, W, R)           # (H, W, R)

        exact_cells = {}      # (LH, LW) -> [LH][LW] list of (1, R) cell maxima
        off = 0
        for (kh, kw, ph, pw, LH, LW) in levels:
            is_exact = (ph == 0 and pw == 0 and kh * LH == H and kw * LW == W)

            # Hierarchical source: finest already-computed exact level whose
            # grid is an exact refinement of this one.
            src = None
            if is_exact:
                for key in exact_cells:
                    if key[0] % LH == 0 and key[1] % LW == 0:
                        if src is None or key[0] * key[1] < src[0] * src[1]:
                            src = key

            cells = []
            if src is not None:
                rh, rw = src[0] // LH, src[1] // LW
                grid_src = exact_cells[src]
                for oh in range(LH):
                    row = []
                    for ow in range(LW):
                        sub = [grid_src[oh * rh + i][ow * rw + j]
                               for i in range(rh) for j in range(rw)]
                        row.append(functools.reduce(jnp.maximum, sub))
                    cells.append(row)
            else:
                # Pad-free windowed max: windows clamped to valid data, which
                # is exactly what -inf padding gives a max pool.
                for oh in range(LH):
                    hs = max(oh * kh - ph, 0)
                    he = min(oh * kh - ph + kh, H)
                    hslab = jnp.max(t[hs:he], axis=0)    # (W, R): VPU maxima
                    row = []
                    for ow in range(LW):
                        ws = max(ow * kw - pw, 0)
                        we = min(ow * kw - pw + kw, W)
                        # small sublane-window reduce (kw <= 16 sublanes)
                        row.append(jnp.max(hslab[ws:we, :], axis=0,
                                           keepdims=True))  # (1, R)
                    cells.append(row)

            if is_exact:
                exact_cells[(LH, LW)] = cells

            lvl = jnp.concatenate(
                [cells[oh][ow] for oh in range(LH) for ow in range(LW)], axis=0)
            o_ref[off:off + LH * LW, :] = lvl            # lane-dense store
            off += LH * LW

    return kernel


def spatial_pyramid_pooling(x, out_pool_size):
    """x: (N, C, H, W).  Returns (N, C * sum(LH_i*LW_i)) matching PyTorch SPP."""
    N, C, H, W = x.shape
    levels = _level_params(H, W, out_pool_size)
    P = sum(LH * LW for (_, _, _, _, LH, LW) in levels)
    NC, HW = N * C, H * W

    # Zero-copy view (no HBM relayout pass): row = n*C + c, col = h*W + w.
    x2 = x.reshape(NC, HW)

    R = _choose_rows_block(NC, HW * x.dtype.itemsize)
    G = pl.cdiv(NC, R)
    in_blk_bytes = R * HW * x.dtype.itemsize
    out_blk_bytes = P * R * x.dtype.itemsize

    pooled = pl.pallas_call(
        _make_kernel(levels, H, W),
        out_shape=jax.ShapeDtypeStruct((P, G * R), x.dtype),
        grid=(G,),
        # If a trace ever shows exposed DMA between steps on v7x, sweep
        # pipeline_mode=pl.Buffered(3) on this input spec.
        in_specs=[pl.BlockSpec((R, HW), lambda b: (b, 0))],
        out_specs=pl.BlockSpec((P, R), lambda b: (0, b)),
        compiler_params=pltpu.CompilerParams(
            dimension_semantics=("parallel",),
            vmem_limit_bytes=_vmem_limit_bytes(in_blk_bytes, out_blk_bytes)),
    )(x2)

    # Tiny plain-JAX reorder (P*N*C elements) to PyTorch's per-level
    # channel-major flatten:  [c, oh, ow] row-major per level.
    pooled = pooled[:, :NC].reshape(P, N, C)
    pooled = jnp.transpose(pooled, (1, 2, 0))            # (N, C, P)
    parts, off = [], 0
    for (_, _, _, _, LH, LW) in levels:
        parts.append(pooled[:, :, off:off + LH * LW].reshape(N, C * LH * LW))
        off += LH * LW
    return jnp.concatenate(parts, axis=1)


def _reference_spp(x, out_pool_size):
    """Independent NumPy reference matching nn.MaxPool2d (-inf padding)."""
    x = np.asarray(x)
    N, C, H, W = x.shape
    outs = []
    for (kh, kw, ph, pw, LH, LW) in _level_params(H, W, out_pool_size):
        padded = np.full((N, C, H + 2 * ph, W + 2 * pw), -np.inf, dtype=x.dtype)
        padded[:, :, ph:ph + H, pw:pw + W] = x
        o = np.empty((N, C, LH, LW), dtype=x.dtype)
        for oh in range(LH):
            for ow in range(LW):
                win = padded[:, :, oh * kh:oh * kh + kh, ow * kw:ow * kw + kw]
                o[:, :, oh, ow] = win.max(axis=(2, 3))
        outs.append(o.reshape(N, -1))
    return np.concatenate(outs, axis=1)


if __name__ == "__main__":
    key = jax.random.PRNGKey(0)
    # previous_conv_size = (16, 16); out_pool_size exercises the padded case (n=3).
    out_pool_size = [4, 3, 2, 1]
    N, C, H, W = 2, 4, 16, 16
    x = jax.random.normal(key, (N, C, H, W), dtype=jnp.float32)

    spp = jax.block_until_ready(spatial_pyramid_pooling(x, out_pool_size))

    ref = _reference_spp(np.asarray(x), out_pool_size)
    assert spp.shape == (N, C * (16 + 9 + 4 + 1)), spp.shape
    np.testing.assert_allclose(np.asarray(spp), ref, rtol=1e-6, atol=1e-6)

    print("KERNEL_OK")
</pallas_src>

<mosaic_0001>
module attributes {stable_mosaic.version = 11 : i64} {
  func.func @kernel(%arg0: i32, %arg1: memref<8x256xf32, #tpu.memory_space<vmem>>, %arg2: memref<30x8xf32, #tpu.memory_space<vmem>>) attributes {dimension_semantics = [#tpu.dimension_semantics<parallel>], iteration_bounds = array<i64: 1>, scalar_prefetch = 0 : i64, scratch_operands = 0 : i64, tpu.core_type = #tpu.core_type<tc>, window_params = [{transform_indices = @transform_0, window_bounds = array<i64: 8, 256>}, {transform_indices = @transform_1, window_bounds = array<i64: 30, 8>}]} {
    %c0 = arith.constant 0 : index
    %c0_0 = arith.constant 0 : index
    %0 = vector.load %arg1[%c0, %c0_0] : memref<8x256xf32, #tpu.memory_space<vmem>>, vector<8x256xf32>
    %1 = tpu.transpose %0, [1, 0] : vector<8x256xf32> -> vector<256x8xf32>
    %2 = vector.shape_cast %1 : vector<256x8xf32> to vector<16x16x8xf32>
    %3 = vector.extract_strided_slice %2 {offsets = [0, 0, 0], sizes = [4, 16, 8], strides = [1, 1, 1]} : vector<16x16x8xf32> to vector<4x16x8xf32>
    %cst = arith.constant dense<0xFF800000> : vector<16x8xf32>
    %4 = vector.multi_reduction <maximumf>, %3, %cst [0] : vector<4x16x8xf32> to vector<16x8xf32>
    %5 = vector.extract_strided_slice %4 {offsets = [0, 0], sizes = [4, 8], strides = [1, 1]} : vector<16x8xf32> to vector<4x8xf32>
    %cst_1 = arith.constant dense<0xFF800000> : vector<8xf32>
    %6 = vector.multi_reduction <maximumf>, %5, %cst_1 [0] : vector<4x8xf32> to vector<8xf32>
    %7 = vector.shape_cast %6 : vector<8xf32> to vector<1x8xf32>
    %8 = vector.extract_strided_slice %4 {offsets = [4, 0], sizes = [4, 8], strides = [1, 1]} : vector<16x8xf32> to vector<4x8xf32>
    %cst_2 = arith.constant dense<0xFF800000> : vector<8xf32>
    %9 = vector.multi_reduction <maximumf>, %8, %cst_2 [0] : vector<4x8xf32> to vector<8xf32>
    %10 = vector.shape_cast %9 : vector<8xf32> to vector<1x8xf32>
    %11 = vector.extract_strided_slice %4 {offsets = [8, 0], sizes = [4, 8], strides = [1, 1]} : vector<16x8xf32> to vector<4x8xf32>
    %cst_3 = arith.constant dense<0xFF800000> : vector<8xf32>
    %12 = vector.multi_reduction <maximumf>, %11, %cst_3 [0] : vector<4x8xf32> to vector<8xf32>
    %13 = vector.shape_cast %12 : vector<8xf32> to vector<1x8xf32>
    %14 = vector.extract_strided_slice %4 {offsets = [12, 0], sizes = [4, 8], strides = [1, 1]} : vector<16x8xf32> to vector<4x8xf32>
    %cst_4 = arith.constant dense<0xFF800000> : vector<8xf32>
    %15 = vector.multi_reduction <maximumf>, %14, %cst_4 [0] : vector<4x8xf32> to vector<8xf32>
    %16 = vector.shape_cast %15 : vector<8xf32> to vector<1x8xf32>
    %17 = vector.extract_strided_slice %2 {offsets = [4, 0, 0], sizes = [4, 16, 8], strides = [1, 1, 1]} : vector<16x16x8xf32> to vector<4x16x8xf32>
    %cst_5 = arith.constant dense<0xFF800000> : vector<16x8xf32>
    %18 = vector.multi_reduction <maximumf>, %17, %cst_5 [0] : vector<4x16x8xf32> to vector<16x8xf32>
    %19 = vector.extract_strided_slice %18 {offsets = [0, 0], sizes = [4, 8], strides = [1, 1]} : vector<16x8xf32> to vector<4x8xf32>
    %cst_6 = arith.constant dense<0xFF800000> : vector<8xf32>
    %20 = vector.multi_reduction <maximumf>, %19, %cst_6 [0] : vector<4x8xf32> to vector<8xf32>
    %21 = vector.shape_cast %20 : vector<8xf32> to vector<1x8xf32>
    %22 = vector.extract_strided_slice %18 {offsets = [4, 0], sizes = [4, 8], strides = [1, 1]} : vector<16x8xf32> to vector<4x8xf32>
    %cst_7 = arith.constant dense<0xFF800000> : vector<8xf32>
    %23 = vector.multi_reduction <maximumf>, %22, %cst_7 [0] : vector<4x8xf32> to vector<8xf32>
    %24 = vector.shape_cast %23 : vector<8xf32> to vector<1x8xf32>
    %25 = vector.extract_strided_slice %18 {offsets = [8, 0], sizes = [4, 8], strides = [1, 1]} : vector<16x8xf32> to vector<4x8xf32>
    %cst_8 = arith.constant dense<0xFF800000> : vector<8xf32>
    %26 = vector.multi_reduction <maximumf>, %25, %cst_8 [0] : vector<4x8xf32> to vector<8xf32>
    %27 = vector.shape_cast %26 : vector<8xf32> to vector<1x8xf32>
    %28 = vector.extract_strided_slice %18 {offsets = [12, 0], sizes = [4, 8], strides = [1, 1]} : vector<16x8xf32> to vector<4x8xf32>
    %cst_9 = arith.constant dense<0xFF800000> : vector<8xf32>
    %29 = vector.multi_reduction <maximumf>, %28, %cst_9 [0] : vector<4x8xf32> to vector<8xf32>
    %30 = vector.shape_cast %29 : vector<8xf32> to vector<1x8xf32>
    %31 = vector.extract_strided_slice %2 {offsets = [8, 0, 0], sizes = [4, 16, 8], strides = [1, 1, 1]} : vector<16x16x8xf32> to vector<4x16x8xf32>
    %cst_10 = arith.constant dense<0xFF800000> : vector<16x8xf32>
    %32 = vector.multi_reduction <maximumf>, %31, %cst_10 [0] : vector<4x16x8xf32> to vector<16x8xf32>
    %33 = vector.extract_strided_slice %32 {offsets = [0, 0], sizes = [4, 8], strides = [1, 1]} : vector<16x8xf32> to vector<4x8xf32>
    %cst_11 = arith.constant dense<0xFF800000> : vector<8xf32>
    %34 = vector.multi_reduction <maximumf>, %33, %cst_11 [0] : vector<4x8xf32> to vector<8xf32>
    %35 = vector.shape_cast %34 : vector<8xf32> to vector<1x8xf32>
    %36 = vector.extract_strided_slice %32 {offsets = [4, 0], sizes = [4, 8], strides = [1, 1]} : vector<16x8xf32> to vector<4x8xf32>
    %cst_12 = arith.constant dense<0xFF800000> : vector<8xf32>
    %37 = vector.multi_reduction <maximumf>, %36, %cst_12 [0] : vector<4x8xf32> to vector<8xf32>
    %38 = vector.shape_cast %37 : vector<8xf32> to vector<1x8xf32>
    %39 = vector.extract_strided_slice %32 {offsets = [8, 0], sizes = [4, 8], strides = [1, 1]} : vector<16x8xf32> to vector<4x8xf32>
    %cst_13 = arith.constant dense<0xFF800000> : vector<8xf32>
    %40 = vector.multi_reduction <maximumf>, %39, %cst_13 [0] : vector<4x8xf32> to vector<8xf32>
    %41 = vector.shape_cast %40 : vector<8xf32> to vector<1x8xf32>
    %42 = vector.extract_strided_slice %32 {offsets = [12, 0], sizes = [4, 8], strides = [1, 1]} : vector<16x8xf32> to vector<4x8xf32>
    %cst_14 = arith.constant dense<0xFF800000> : vector<8xf32>
    %43 = vector.multi_reduction <maximumf>, %42, %cst_14 [0] : vector<4x8xf32> to vector<8xf32>
    %44 = vector.shape_cast %43 : vector<8xf32> to vector<1x8xf32>
    %45 = vector.extract_strided_slice %2 {offsets = [12, 0, 0], sizes = [4, 16, 8], strides = [1, 1, 1]} : vector<16x16x8xf32> to vector<4x16x8xf32>
    %cst_15 = arith.constant dense<0xFF800000> : vector<16x8xf32>
    %46 = vector.multi_reduction <maximumf>, %45, %cst_15 [0] : vector<4x16x8xf32> to vector<16x8xf32>
    %47 = vector.extract_strided_slice %46 {offsets = [0, 0], sizes = [4, 8], strides = [1, 1]} : vector<16x8xf32> to vector<4x8xf32>
    %cst_16 = arith.constant dense<0xFF800000> : vector<8xf32>
    %48 = vector.multi_reduction <maximumf>, %47, %cst_16 [0] : vector<4x8xf32> to vector<8xf32>
    %49 = vector.shape_cast %48 : vector<8xf32> to vector<1x8xf32>
    %50 = vector.extract_strided_slice %46 {offsets = [4, 0], sizes = [4, 8], strides = [1, 1]} : vector<16x8xf32> to vector<4x8xf32>
    %cst_17 = arith.constant dense<0xFF800000> : vector<8xf32>
    %51 = vector.multi_reduction <maximumf>, %50, %cst_17 [0] : vector<4x8xf32> to vector<8xf32>
    %52 = vector.shape_cast %51 : vector<8xf32> to vector<1x8xf32>
    %53 = vector.extract_strided_slice %46 {offsets = [8, 0], sizes = [4, 8], strides = [1, 1]} : vector<16x8xf32> to vector<4x8xf32>
    %cst_18 = arith.constant dense<0xFF800000> : vector<8xf32>
    %54 = vector.multi_reduction <maximumf>, %53, %cst_18 [0] : vector<4x8xf32> to vector<8xf32>
    %55 = vector.shape_cast %54 : vector<8xf32> to vector<1x8xf32>
    %56 = vector.extract_strided_slice %46 {offsets = [12, 0], sizes = [4, 8], strides = [1, 1]} : vector<16x8xf32> to vector<4x8xf32>
    %cst_19 = arith.constant dense<0xFF800000> : vector<8xf32>
    %57 = vector.multi_reduction <maximumf>, %56, %cst_19 [0] : vector<4x8xf32> to vector<8xf32>
    %58 = vector.shape_cast %57 : vector<8xf32> to vector<1x8xf32>
    %59 = tpu.concatenate %7, %10, %13, %16, %21, %24, %27, %30, %35, %38, %41, %44, %49, %52, %55, %58 in 0 : vector<1x8xf32>, vector<1x8xf32>, vector<1x8xf32>, vector<1x8xf32>, vector<1x8xf32>, vector<1x8xf32>, vector<1x8xf32>, vector<1x8xf32>, vector<1x8xf32>, vector<1x8xf32>, vector<1x8xf32>, vector<1x8xf32>, vector<1x8xf32>, vector<1x8xf32>, vector<1x8xf32>, vector<1x8xf32> -> vector<16x8xf32>
    %c0_20 = arith.constant 0 : index
    %c0_21 = arith.constant 0 : index
    %60 = vector.load %arg2[%c0_20, %c0_21] : memref<30x8xf32, #tpu.memory_space<vmem>>, vector<16x8xf32>
    tpu.vector_store %arg2[%c0_20, %c0_21], %59 {strides = array<i32>} : memref<30x8xf32, #tpu.memory_space<vmem>>, vector<16x8xf32>,
    %61 = vector.extract_strided_slice %2 {offsets = [0, 0, 0], sizes = [5, 16, 8], strides = [1, 1, 1]} : vector<16x16x8xf32> to vector<5x16x8xf32>
    %cst_22 = arith.constant dense<0xFF800000> : vector<16x8xf32>
    %62 = vector.multi_reduction <maximumf>, %61, %cst_22 [0] : vector<5x16x8xf32> to vector<16x8xf32>
    %63 = vector.extract_strided_slice %62 {offsets = [0, 0], sizes = [5, 8], strides = [1, 1]} : vector<16x8xf32> to vector<5x8xf32>
    %cst_23 = arith.constant dense<0xFF800000> : vector<8xf32>
    %64 = vector.multi_reduction <maximumf>, %63, %cst_23 [0] : vector<5x8xf32> to vector<8xf32>
    %65 = vector.shape_cast %64 : vector<8xf32> to vector<1x8xf32>
    %66 = vector.extract_strided_slice %62 {offsets = [5, 0], sizes = [6, 8], strides = [1, 1]} : vector<16x8xf32> to vector<6x8xf32>
    %cst_24 = arith.constant dense<0xFF800000> : vector<8xf32>
    %67 = vector.multi_reduction <maximumf>, %66, %cst_24 [0] : vector<6x8xf32> to vector<8xf32>
    %68 = vector.shape_cast %67 : vector<8xf32> to vector<1x8xf32>
    %69 = vector.extract_strided_slice %62 {offsets = [11, 0], sizes = [5, 8], strides = [1, 1]} : vector<16x8xf32> to vector<5x8xf32>
    %cst_25 = arith.constant dense<0xFF800000> : vector<8xf32>
    %70 = vector.multi_reduction <maximumf>, %69, %cst_25 [0] : vector<5x8xf32> to vector<8xf32>
    %71 = vector.shape_cast %70 : vector<8xf32> to vector<1x8xf32>
    %72 = vector.extract_strided_slice %2 {offsets = [5, 0, 0], sizes = [6, 16, 8], strides = [1, 1, 1]} : vector<16x16x8xf32> to vector<6x16x8xf32>
    %cst_26 = arith.constant dense<0xFF800000> : vector<16x8xf32>
    %73 = vector.multi_reduction <maximumf>, %72, %cst_26 [0] : vector<6x16x8xf32> to vector<16x8xf32>
    %74 = vector.extract_strided_slice %73 {offsets = [0, 0], sizes = [5, 8], strides = [1, 1]} : vector<16x8xf32> to vector<5x8xf32>
    %cst_27 = arith.constant dense<0xFF800000> : vector<8xf32>
    %75 = vector.multi_reduction <maximumf>, %74, %cst_27 [0] : vector<5x8xf32> to vector<8xf32>
    %76 = vector.shape_cast %75 : vector<8xf32> to vector<1x8xf32>
    %77 = vector.extract_strided_slice %73 {offsets = [5, 0], sizes = [6, 8], strides = [1, 1]} : vector<16x8xf32> to vector<6x8xf32>
    %cst_28 = arith.constant dense<0xFF800000> : vector<8xf32>
    %78 = vector.multi_reduction <maximumf>, %77, %cst_28 [0] : vector<6x8xf32> to vector<8xf32>
    %79 = vector.shape_cast %78 : vector<8xf32> to vector<1x8xf32>
    %80 = vector.extract_strided_slice %73 {offsets = [11, 0], sizes = [5, 8], strides = [1, 1]} : vector<16x8xf32> to vector<5x8xf32>
    %cst_29 = arith.constant dense<0xFF800000> : vector<8xf32>
    %81 = vector.multi_reduction <maximumf>, %80, %cst_29 [0] : vector<5x8xf32> to vector<8xf32>
    %82 = vector.shape_cast %81 : vector<8xf32> to vector<1x8xf32>
    %83 = vector.extract_strided_slice %2 {offsets = [11, 0, 0], sizes = [5, 16, 8], strides = [1, 1, 1]} : vector<16x16x8xf32> to vector<5x16x8xf32>
    %cst_30 = arith.constant dense<0xFF800000> : vector<16x8xf32>
    %84 = vector.multi_reduction <maximumf>, %83, %cst_30 [0] : vector<5x16x8xf32> to vector<16x8xf32>
    %85 = vector.extract_strided_slice %84 {offsets = [0, 0], sizes = [5, 8], strides = [1, 1]} : vector<16x8xf32> to vector<5x8xf32>
    %cst_31 = arith.constant dense<0xFF800000> : vector<8xf32>
    %86 = vector.multi_reduction <maximumf>, %85, %cst_31 [0] : vector<5x8xf32> to vector<8xf32>
    %87 = vector.shape_cast %86 : vector<8xf32> to vector<1x8xf32>
    %88 = vector.extract_strided_slice %84 {offsets = [5, 0], sizes = [6, 8], strides = [1, 1]} : vector<16x8xf32> to vector<6x8xf32>
    %cst_32 = arith.constant dense<0xFF800000> : vector<8xf32>
    %89 = vector.multi_reduction <maximumf>, %88, %cst_32 [0] : vector<6x8xf32> to vector<8xf32>
    %90 = vector.shape_cast %89 : vector<8xf32> to vector<1x8xf32>
    %91 = vector.extract_strided_slice %84 {offsets = [11, 0], sizes = [5, 8], strides = [1, 1]} : vector<16x8xf32> to vector<5x8xf32>
    %cst_33 = arith.constant dense<0xFF800000> : vector<8xf32>
    %92 = vector.multi_reduction <maximumf>, %91, %cst_33 [0] : vector<5x8xf32> to vector<8xf32>
    %93 = vector.shape_cast %92 : vector<8xf32> to vector<1x8xf32>
    %94 = tpu.concatenate %65, %68, %71, %76, %79, %82, %87, %90, %93 in 0 : vector<1x8xf32>, vector<1x8xf32>, vector<1x8xf32>, vector<1x8xf32>, vector<1x8xf32>, vector<1x8xf32>, vector<1x8xf32>, vector<1x8xf32>, vector<1x8xf32> -> vector<9x8xf32>
    %c16 = arith.constant 16 : index
    %c0_34 = arith.constant 0 : index
    %95 = vector.load %arg2[%c16, %c0_34] : memref<30x8xf32, #tpu.memory_space<vmem>>, vector<9x8xf32>
    tpu.vector_store %arg2[%c16, %c0_34], %94 {strides = array<i32>} : memref<30x8xf32, #tpu.memory_space<vmem>>, vector<9x8xf32>,
    %96 = arith.maximumf %7, %10 : vector<1x8xf32>
    %97 = arith.maximumf %96, %21 : vector<1x8xf32>
    %98 = arith.maximumf %97, %24 : vector<1x8xf32>
    %99 = arith.maximumf %13, %16 : vector<1x8xf32>
    %100 = arith.maximumf %99, %27 : vector<1x8xf32>
    %101 = arith.maximumf %100, %30 : vector<1x8xf32>
    %102 = arith.maximumf %35, %38 : vector<1x8xf32>
    %103 = arith.maximumf %102, %49 : vector<1x8xf32>
    %104 = arith.maximumf %103, %52 : vector<1x8xf32>
    %105 = arith.maximumf %41, %44 : vector<1x8xf32>
    %106 = arith.maximumf %105, %55 : vector<1x8xf32>
    %107 = arith.maximumf %106, %58 : vector<1x8xf32>
    %108 = tpu.concatenate %98, %101, %104, %107 in 0 : vector<1x8xf32>, vector<1x8xf32>, vector<1x8xf32>, vector<1x8xf32> -> vector<4x8xf32>
    %c25 = arith.constant 25 : index
    %c0_35 = arith.constant 0 : index
    %109 = vector.load %arg2[%c25, %c0_35] : memref<30x8xf32, #tpu.memory_space<vmem>>, vector<4x8xf32>
    tpu.vector_store %arg2[%c25, %c0_35], %108 {strides = array<i32>} : memref<30x8xf32, #tpu.memory_space<vmem>>, vector<4x8xf32>,
    %110 = arith.maximumf %98, %101 : vector<1x8xf32>
    %111 = arith.maximumf %110, %104 : vector<1x8xf32>
    %112 = arith.maximumf %111, %107 : vector<1x8xf32>
    %c29 = arith.constant 29 : index
    %c0_36 = arith.constant 0 : index
    %113 = vector.load %arg2[%c29, %c0_36] : memref<30x8xf32, #tpu.memory_space<vmem>>, vector<1x8xf32>
    tpu.vector_store %arg2[%c29, %c0_36], %112 {strides = array<i32>} : memref<30x8xf32, #tpu.memory_space<vmem>>, vector<1x8xf32>,
    return
  }
  func.func @transform_0(%arg0: i32) -> (i32, i32) {
    %c0_i32 = arith.constant 0 : i32
    %c0_i32_0 = arith.constant 0 : i32
    return %arg0, %c0_i32 : i32, i32
  }
  func.func @transform_1(%arg0: i32) -> (i32, i32) {
    %c0_i32 = arith.constant 0 : i32
    %c0_i32_0 = arith.constant 0 : i32
    return %c0_i32, %arg0 : i32, i32
  }
}

</mosaic_0001>

<bundles_post_ra>
// kernel: tpu_custom_call.1
= control target key start
LH: loop header
LB: loop body
LE: loop exit
PB: predicated region body
PF: predicated region fallthrough
CT: control target
= control target key end

     0   :  { %6 = vsyncpa [#allocation3], 0  ;;  %s430_s6 = smov [#allocation2]   ;;  %s615_s0 = inlined_call_operand.hbm [shape: f32[8,256], index: 0, kind: input, shape index: {}]   ;;  %s616_s1 = inlined_call_operand.vmem [shape: f32[30,8], index: 1, kind: output, shape index: {}]  }
   0x1   :  { %s13_s7 = sshll.u32 %s430_s6, 4  ;;  %s14_s7 = int_to_ptr.vmem [resolvable:$true] %s13_s7 }
   0x2   :  { %s416_s8 = scalar_lea.vmem %s14_s7, 256  ;;  %p421_p1 = scmp.lt.s32.totalorder %s14_s7, %s14_s7 }
   0x3   :  { %p417_p0 = scmp.ne.s32.totalorder %s14_s7, %s416_s8  ;;  %p422_p2 = scmp.lt.s32.totalorder %s416_s8, %s416_s8 }
   0x5   :  { %p423_p3 = por %p422_p2, %p421_p1 }
   0x7   :  { %p424_p4 = pnand %p423_p3, %p417_p0 }
   0x9   :  { %427 = shalt.err (!%p424_p4)
}
   0xa   :  { %16 = dma.hbm_to_vmem [thread:$0]  %s615_s0, 256, %s14_s7, [#allocation3]  }
   0xb   :  { %428 = dma.done.wait [#allocation3], 256  }
   0xc   :  { %429 = vsyncadd [#allocation3], 4294967040  ;;  %v20_v0 = vld [vmem:[#allocation2] sm:$0xff]  ;;  %v21_v1 = vld [vmem:[#allocation2 + $0x8] sm:$0xff]  ;;  %vm86_vm0 = vcmask 64512   ;;  %vm101_vm1 = vcmask 60416  }
   0xd   :  { %22 = vxpose.xlu0.b32.start.end [1/1] (short) %v20_v0, 128  ;;  %vm109_vm2 = vcmask 64516   ;;  %vm284_vm3 = vcmask 61440   ;;  %vm292_vm4 = vcmask 64517   ;;  %vm294_vm5 = vcmask 59392  }
   0xe   :  { %vm303_vm6 = vcmask 64515   ;;  %vm257_vm7 = vcmask 1040384   ;;  %vm259_vm8 = vcmask 1041408   ;;  %vm261_vm9 = vcmask 1042432  }
   0xf   :  { %vm263_vm10 = vcmask 1043456   ;;  %vm265_vm11 = vcmask 1044480   ;;  %vm267_vm12 = vcmask 1045504   ;;  %vm269_vm13 = vcmask 1046528  }
  0x10   :  { %vm379_vm14 = vcmask 57344  }
  0x4a   :  { %54 = vxpose.xlu0.b32.start.end [1/1] (short) %v21_v1, 128 }
  0x89   :  { %v38_v2 = vpop.trf.xlu0 }
  0x8a   :  { %v87_v10 = vsel %vm86_vm0, %v38_v2, -inf }
  0x8d   :  { %v39_v3 = vpop.trf.xlu0 }
  0x8e   :  { %v94_v29 = vsel %vm86_vm0, %v39_v3, -inf }
  0x91   :  { %v40_v4 = vpop.trf.xlu0 }
  0x92   :  { %v88_v11 = vsel %vm86_vm0, %v40_v4, -inf }
  0x95   :  { %v41_v5 = vpop.trf.xlu0 }
  0x96   :  { %v95_v22 = vsel %vm86_vm0, %v41_v5, -inf }
  0x99   :  { %v42_v6 = vpop.trf.xlu0 }
  0x9a   :  { %v89_v8 = vsel %vm86_vm0, %v42_v6, -inf }
  0x9b   :  { %v90_v13 = vmax.f32 %v87_v10, %v89_v8 }
  0x9d   :  { %v43_v7 = vpop.trf.xlu0 }
  0x9e   :  { %v96_v23 = vsel %vm86_vm0, %v43_v7, -inf }
  0x9f   :  { %v97_v31 = vmax.f32 %v94_v29, %v96_v23 }
  0xa1   :  { %v44_v9 = vpop.trf.xlu0 }
  0xa2   :  { %v91_v12 = vsel %vm86_vm0, %v44_v9, -inf }
  0xa3   :  { %v92_v14 = vmax.f32 %v88_v11, %v91_v12 }
  0xa5   :  { %v93_v15 = vmax.f32 %v90_v13, %v92_v14  ;;  %v45_v16 = vpop.trf.xlu0 }
  0xa6   :  { %v98_v19 = vsel %vm86_vm0, %v45_v16, -inf }
  0xa7   :  { %v102_v17 = vsel %vm101_vm1, %v93_v15, -inf  ;;  %v110_v18 = vsel %vm109_vm2, %v93_v15, -inf  ;;  %v99_v27 = vmax.f32 %v95_v22, %v98_v19 }
  0xa8   :  { %v103_v20 = vrot.slane %v102_v17, 4  ;;  %v111_v21 = vrot.slane %v110_v18, 4 }
  0xa9   :  { %v46_v24 = vpop.trf.xlu0  ;;  %v100_v38 = vmax.f32 %v97_v31, %v99_v27 }
  0xaa   :  { %v104_v25 = vmax.f32 %v102_v17, %v103_v20  ;;  %v112_v26 = vmax.f32 %v110_v18, %v111_v21  ;;  %v454_v28 = vsel %vm86_vm0, %v46_v24, -inf }
  0xab   :  { %v280_v30 = vmax.f32 %v90_v13, %v454_v28  ;;  %v117_v48 = vsel %vm101_vm1, %v100_v38, -inf  ;;  %v124_v57 = vsel %vm109_vm2, %v100_v38, -inf }
  0xac   :  { %v105_v32 = vrot.slane %v104_v25, 2  ;;  %v113_v33 = vrot.slane %v112_v26, 2  ;;  %v118_v52 = vrot.slane %v117_v48, 4  ;;  %v125_v0 = vrot.slane %v124_v57, 4 }
  0xad   :  { %v281_v34 = vmax.f32 %v280_v30, %v92_v14  ;;  %v47_v35 = vpop.trf.xlu0 }
  0xae   :  { %v106_v36 = vmax.f32 %v104_v25, %v105_v32  ;;  %v114_v37 = vmax.f32 %v112_v26, %v113_v33  ;;  %v460_v40 = vsel %vm86_vm0, %v47_v35, -inf  ;;  %v119_v63 = vmax.f32 %v117_v48, %v118_v52 }
  0xaf   :  { %v285_v39 = vsel %vm284_vm3, %v281_v34, -inf  ;;  %v282_v44 = vmax.f32 %v97_v31, %v460_v40  ;;  %v293_v53 = vsel %vm292_vm4, %v281_v34, -inf  ;;  %v126_v8 = vmax.f32 %v124_v57, %v125_v0 }
  0xb0   :  { %v107_v41 = vrot.slane %v106_v36, 1  ;;  %v115_v42 = vrot.slane %v114_v37, 1  ;;  %v286_v43 = vrot.slane %v285_v39, 4  ;;  %v120_v7 = vrot.slane %v119_v63, 2 }
  0xb1   :  { %v48_v45 = vpop.trf.xlu0  ;;  %v283_v50 = vmax.f32 %v282_v44, %v99_v27  ;;  %v127_v16 = vrot.slane %v126_v8, 2 }
  0xb2   :  { %v463_v46 = vmax.f32 %v106_v36, %v107_v41  ;;  %v465_v47 = vmax.f32 %v114_v37, %v115_v42  ;;  %v287_v49 = vmax.f32 %v285_v39, %v286_v43  ;;  %v121_v15 = vmax.f32 %v119_v63, %v120_v7 }
  0xb3   :  { %v295_v54 = vsel %vm294_vm5, %v283_v50, -inf  ;;  %v304_v55 = vsel %vm303_vm6, %v283_v50, -inf  ;;  %v132_v20 = vsel %vm86_vm0, %v48_v45, -inf  ;;  %v128_v32 = vmax.f32 %v126_v8, %v127_v16 }
  0xb4   :  { %v381_v51 = vmax.f32 %v463_v46, %v465_v47  ;;  %v288_v58 = vrot.slane %v287_v49, 2  ;;  %v296_v59 = vmax.f32 %v293_v53, %v295_v54  ;;  %v305_v60 = vrot.slane %v304_v55, 4 }
  0xb5   :  { %v49_v56 = vpop.trf.xlu0  ;;  %v122_v31 = vrot.slane %v121_v15, 1  ;;  %v129_v48 = vrot.slane %v128_v32, 1 }
  0xb6   :  { %v297_v61 = vrot.slane %v296_v59, 4  ;;  %v306_v62 = vmax.f32 %v304_v55, %v305_v60  ;;  %v289_v2 = vmax.f32 %v287_v49, %v288_v58  ;;  %v139_v33 = vsel %vm86_vm0, %v49_v56, -inf }
  0xb7   :  { %v123_v45 = vmax.f32 %v121_v15, %v122_v31  ;;  %v258_v55 = vsel %vm257_vm7, %v463_v46, %v465_v47 }
  0xb8   :  { %v298_v3 = vmax.f32 %v296_v59, %v297_v61  ;;  %v307_v4 = vrot.slane %v306_v62, 2  ;;  %v290_v10 = vrot.slane %v289_v2, 1  ;;  %v130_v61 = vmax.f32 %v128_v32, %v129_v48 }
  0xb9   :  { %v50_v1 = vpop.trf.xlu0 }
  0xba   :  { %v299_v5 = vrot.slane %v298_v3, 2  ;;  %v308_v6 = vmax.f32 %v306_v62, %v307_v4  ;;  %v475_v14 = vsel %vm86_vm0, %v50_v1, -inf  ;;  %v291_v18 = vmax.f32 %v289_v2, %v290_v10 }
  0xbb   :  { %v134_v23 = vmax.f32 %v454_v28, %v475_v14  ;;  %v260_v62 = vsel %vm259_vm8, %v258_v55, %v123_v45 }
  0xbc   :  { %v300_v11 = vmax.f32 %v298_v3, %v299_v5  ;;  %v309_v12 = vrot.slane %v308_v6, 1  ;;  %v262_v7 = vsel %vm261_vm9, %v260_v62, %v130_v61 }
  0xbd   :  { %v51_v9 = vpop.trf.xlu0 }
  0xbe   :  { %v301_v13 = vrot.slane %v300_v11, 1  ;;  %v310_v22 = vmax.f32 %v308_v6, %v309_v12  ;;  %v485_v26 = vsel %vm86_vm0, %v51_v9, -inf }
  0xbf   :  { %v141_v34 = vmax.f32 %v460_v40, %v485_v26 }
  0xc0   :  { %v302_v19 = vmax.f32 %v300_v11, %v301_v13  ;;  %v384_v13 = vmax.f32 %v123_v45, %v130_v61 }
  0xc1   :  { %v52_v17 = vpop.trf.xlu0 }
  0xc2   :  { %v135_v21 = vsel %vm86_vm0, %v52_v17, -inf  ;;  %v371_v25 = vsel %vm257_vm7, %v291_v18, %v302_v19 }
  0xc3   :  { %v481_v24 = vmax.f32 %v132_v20, %v135_v21  ;;  %v488_v27 = vsel %vm259_vm8, %v371_v25, %v310_v22 }
  0xc5   :  { %v137_v29 = vmax.f32 %v134_v23, %v481_v24  ;;  %v53_v30 = vpop.trf.xlu0 }
  0xc6   :  { %v142_v28 = vsel %vm86_vm0, %v53_v30, -inf }
  0xc7   :  { %v145_v35 = vsel %vm101_vm1, %v137_v29, -inf  ;;  %v152_v36 = vsel %vm109_vm2, %v137_v29, -inf  ;;  %v497_v37 = vmax.f32 %v139_v33, %v142_v28 }
  0xc8   :  { %v146_v38 = vrot.slane %v145_v35, 4  ;;  %v153_v39 = vrot.slane %v152_v36, 4 }
  0xc9   :  { %v144_v41 = vmax.f32 %v141_v34, %v497_v37  ;;  %v70_v42 = vpop.trf.xlu0 }
  0xca   :  { %v147_v43 = vmax.f32 %v145_v35, %v146_v38  ;;  %v154_v44 = vmax.f32 %v152_v36, %v153_v39  ;;  %v173_v19 = vsel %vm86_vm0, %v70_v42, -inf }
  0xcb   :  { %v159_v49 = vsel %vm101_vm1, %v144_v41, -inf  ;;  %v166_v50 = vsel %vm109_vm2, %v144_v41, -inf }
  0xcc   :  { %v148_v40 = vrot.slane %v147_v43, 2  ;;  %v155_v52 = vrot.slane %v154_v44, 2  ;;  %v160_v53 = vrot.slane %v159_v49, 4  ;;  %v167_v54 = vrot.slane %v166_v50, 4 }
  0xcd   :  { %v71_v56 = vpop.trf.xlu0 }
  0xce   :  { %v149_v57 = vmax.f32 %v147_v43, %v148_v40  ;;  %v156_v58 = vmax.f32 %v154_v44, %v155_v52  ;;  %v161_v59 = vmax.f32 %v159_v49, %v160_v53  ;;  %v168_v60 = vmax.f32 %v166_v50, %v167_v54 }
  0xcf   :  { %v180_v29 = vsel %vm86_vm0, %v71_v56, -inf }
  0xd0   :  { %v150_v63 = vrot.slane %v149_v57, 1  ;;  %v157_v0 = vrot.slane %v156_v58, 1  ;;  %v162_v1 = vrot.slane %v161_v59, 2  ;;  %v169_v2 = vrot.slane %v168_v60, 2 }
  0xd1   :  { %v72_v3 = vpop.trf.xlu0  ;;  %v315_v34 = vmax.f32 %v485_v26, %v180_v29 }
  0xd2   :  { %v151_v4 = vmax.f32 %v149_v57, %v150_v63  ;;  %v163_v5 = vmax.f32 %v161_v59, %v162_v1  ;;  %v170_v6 = vmax.f32 %v168_v60, %v169_v2  ;;  %v158_v8 = vmax.f32 %v156_v58, %v157_v0 }
  0xd3   :  { %v174_v46 = vsel %vm86_vm0, %v72_v3, -inf }
  0xd4   :  { %v264_v9 = vsel %vm263_vm10, %v262_v7, %v151_v4  ;;  %v382_v10 = vmax.f32 %v381_v51, %v151_v4  ;;  %v164_v11 = vrot.slane %v163_v5, 1  ;;  %v171_v12 = vrot.slane %v170_v6, 1 }
  0xd5   :  { %v73_v15 = vpop.trf.xlu0  ;;  %v266_v20 = vsel %vm265_vm11, %v264_v9, %v158_v8  ;;  %v311_v51 = vmax.f32 %v475_v14, %v173_v19  ;;  %v312_v31 = vmax.f32 %v481_v24, %v174_v46 }
  0xd6   :  { %v511_v16 = vmax.f32 %v382_v10, %v158_v8  ;;  %v165_v17 = vmax.f32 %v163_v5, %v164_v11  ;;  %v172_v18 = vmax.f32 %v170_v6, %v171_v12  ;;  %v181_v28 = vsel %vm86_vm0, %v73_v15, -inf }
  0xd7   :  { %v316_v39 = vmax.f32 %v497_v37, %v181_v28 }
  0xd8   :  { %v268_v21 = vsel %vm267_vm12, %v266_v20, %v165_v17  ;;  %v385_v22 = vmax.f32 %v384_v13, %v165_v17 }
  0xd9   :  { %v270_v47 = vsel %vm269_vm13, %v268_v21, %v172_v18  ;;  %v74_v23 = vpop.trf.xlu0 }
  0xda   :  { %278 = vst.msk [vmem:[%s616_s1] sm:$0xff] %vm86_vm0, %v270_v47  ;;  %v523_v25 = vmax.f32 %v385_v22, %v172_v18  ;;  %v175_v30 = vsel %vm86_vm0, %v74_v23, -inf }
  0xdb   :  { %v313_v32 = vmax.f32 %v311_v51, %v175_v30  ;;  %v176_v58 = vmax.f32 %v173_v19, %v175_v30 }
  0xdc   :  { %v531_v33 = vsel %vm257_vm7, %v511_v16, %v523_v25  ;;  %v397_v14 = vmax.f32 %v511_v16, %v523_v25 }
  0xdd   :  { %v314_v35 = vmax.f32 %v312_v31, %v313_v32  ;;  %v75_v36 = vpop.trf.xlu0 }
  0xde   :  { %v182_v38 = vsel %vm86_vm0, %v75_v36, -inf }
  0xdf   :  { %v319_v24 = vsel %vm284_vm3, %v314_v35, -inf  ;;  %v317_v41 = vmax.f32 %v315_v34, %v182_v38  ;;  %v326_v48 = vsel %vm292_vm4, %v314_v35, -inf  ;;  %v183_v7 = vmax.f32 %v180_v29, %v182_v38 }
  0xe0   :  { %v320_v42 = vrot.slane %v319_v24, 4 }
  0xe1   :  { %v318_v43 = vmax.f32 %v316_v39, %v317_v41  ;;  %v76_v44 = vpop.trf.xlu0 }
  0xe2   :  { %v321_v45 = vmax.f32 %v319_v24, %v320_v42  ;;  %v544_v26 = vsel %vm86_vm0, %v76_v44, -inf }
  0xe3   :  { %v327_v49 = vsel %vm294_vm5, %v318_v43, -inf  ;;  %v335_v50 = vsel %vm303_vm6, %v318_v43, -inf  ;;  %v178_v57 = vmax.f32 %v174_v46, %v544_v26 }
  0xe4   :  { %v322_v40 = vrot.slane %v321_v45, 2  ;;  %v328_v52 = vmax.f32 %v326_v48, %v327_v49  ;;  %v336_v53 = vrot.slane %v335_v50, 4 }
  0xe5   :  { %v77_v37 = vpop.trf.xlu0  ;;  %v179_v3 = vmax.f32 %v176_v58, %v178_v57 }
  0xe6   :  { %v323_v54 = vmax.f32 %v321_v45, %v322_v40  ;;  %v329_v55 = vrot.slane %v328_v52, 4  ;;  %v337_v56 = vmax.f32 %v335_v50, %v336_v53  ;;  %v548_v62 = vsel %vm86_vm0, %v77_v37, -inf }
  0xe7   :  { %v185_v4 = vmax.f32 %v181_v28, %v548_v62  ;;  %v187_v11 = vsel %vm101_vm1, %v179_v3, -inf  ;;  %v194_v12 = vsel %vm109_vm2, %v179_v3, -inf }
  0xe8   :  { %v324_v59 = vrot.slane %v323_v54, 1  ;;  %v330_v60 = vmax.f32 %v328_v52, %v329_v55  ;;  %v338_v61 = vrot.slane %v337_v56, 2  ;;  %v188_v18 = vrot.slane %v187_v11, 4 }
  0xe9   :  { %v78_v63 = vpop.trf.xlu0  ;;  %v186_v13 = vmax.f32 %v183_v7, %v185_v4  ;;  %v195_v19 = vrot.slane %v194_v12, 4 }
  0xea   :  { %v325_v0 = vmax.f32 %v323_v54, %v324_v59  ;;  %v331_v1 = vrot.slane %v330_v60, 2  ;;  %v339_v2 = vmax.f32 %v337_v56, %v338_v61  ;;  %v189_v47 = vmax.f32 %v187_v11, %v188_v18 }
  0xeb   :  { %v208_v46 = vsel %vm109_vm2, %v186_v13, -inf  ;;  %v196_v51 = vmax.f32 %v194_v12, %v195_v19  ;;  %v215_v52 = vsel %vm86_vm0, %v78_v63, -inf }
  0xec   :  { %v373_v5 = vsel %vm261_vm9, %v488_v27, %v325_v0  ;;  %v332_v6 = vmax.f32 %v330_v60, %v331_v1  ;;  %v340_v8 = vrot.slane %v339_v2, 1  ;;  %v201_v27 = vsel %vm101_vm1, %v186_v13, -inf }
  0xed   :  { %v79_v9 = vpop.trf.xlu0  ;;  %v202_v29 = vrot.slane %v201_v27, 4  ;;  %v209_v30 = vrot.slane %v208_v46, 4  ;;  %v190_v31 = vrot.slane %v189_v47, 2  ;;  %v197_v32 = vrot.slane %v196_v51, 2 }
  0xee   :  { %v333_v10 = vrot.slane %v332_v6, 1  ;;  %v341_v17 = vmax.f32 %v339_v2, %v340_v8  ;;  %v222_v57 = vsel %vm86_vm0, %v79_v9, -inf }
  0xef   :  { %v203_v34 = vmax.f32 %v201_v27, %v202_v29  ;;  %v210_v35 = vmax.f32 %v208_v46, %v209_v30  ;;  %v191_v36 = vmax.f32 %v189_v47, %v190_v31  ;;  %v198_v38 = vmax.f32 %v196_v51, %v197_v32 }
  0xf0   :  { %v334_v15 = vmax.f32 %v332_v6, %v333_v10 }
  0xf1   :  { %v80_v20 = vpop.trf.xlu0  ;;  %v204_v24 = vrot.slane %v203_v34, 2  ;;  %v211_v41 = vrot.slane %v210_v35, 2  ;;  %v192_v44 = vrot.slane %v191_v36, 1  ;;  %v199_v45 = vrot.slane %v198_v38, 1 }
  0xf2   :  { %v374_v21 = vsel %vm263_vm10, %v373_v5, %v334_v15  ;;  %v216_v42 = vsel %vm86_vm0, %v80_v20, -inf }
  0xf3   :  { %v557_v22 = vsel %vm265_vm11, %v374_v21, %v341_v17  ;;  %v342_v48 = vmax.f32 %v544_v26, %v216_v42  ;;  %v205_v50 = vmax.f32 %v203_v34, %v204_v24  ;;  %v212_v40 = vmax.f32 %v210_v35, %v211_v41 }
  0xf4   :  { %v193_v59 = vmax.f32 %v191_v36, %v192_v44  ;;  %v200_v60 = vmax.f32 %v198_v38, %v199_v45 }
  0xf5   :  { %v81_v23 = vpop.trf.xlu0  ;;  %v206_v1 = vrot.slane %v205_v50, 1  ;;  %v213_v2 = vrot.slane %v212_v40, 1 }
  0xf6   :  { %v223_v37 = vsel %vm86_vm0, %v81_v23, -inf }
  0xf7   :  { %v345_v63 = vmax.f32 %v548_v62, %v223_v37  ;;  %v271_v62 = vsel %vm257_vm7, %v193_v59, %v200_v60  ;;  %v207_v19 = vmax.f32 %v205_v50, %v206_v1  ;;  %v214_v20 = vmax.f32 %v212_v40, %v213_v2 }
  0xf8   :  { %v387_v50 = vmax.f32 %v193_v59, %v200_v60 }
  0xf9   :  { %v82_v28 = vpop.trf.xlu0  ;;  %v272_v36 = vsel %vm259_vm8, %v271_v62, %v207_v19 }
  0xfa   :  { %v217_v43 = vsel %vm86_vm0, %v82_v28, -inf }
  0xfb   :  { %v218_v54 = vmax.f32 %v215_v52, %v217_v43 }
  0xfd   :  { %v83_v39 = vpop.trf.xlu0 }
  0xfe   :  { %v224_v58 = vsel %vm86_vm0, %v83_v39, -inf }
  0xff   :  { %v225_v4 = vmax.f32 %v222_v57, %v224_v58 }
 0x101   :  { %v84_v49 = vpop.trf.xlu0 }
 0x102   :  { %v219_v53 = vsel %vm86_vm0, %v84_v49, -inf }
 0x103   :  { %v220_v55 = vmax.f32 %v216_v42, %v219_v53  ;;  %v343_v56 = vmax.f32 %v342_v48, %v219_v53 }
 0x105   :  { %v221_v61 = vmax.f32 %v218_v54, %v220_v55  ;;  %v344_v26 = vmax.f32 %v343_v56, %v218_v54  ;;  %v85_v0 = vpop.trf.xlu0 }
 0x106   :  { %v226_v3 = vsel %vm86_vm0, %v85_v0, -inf }
 0x107   :  { %v229_v5 = vsel %vm101_vm1, %v221_v61, -inf  ;;  %v236_v6 = vsel %vm109_vm2, %v221_v61, -inf  ;;  %v348_v7 = vsel %vm284_vm3, %v344_v26, -inf  ;;  %v227_v11 = vmax.f32 %v223_v37, %v226_v3 }
 0x108   :  { %v230_v8 = vrot.slane %v229_v5, 4  ;;  %v237_v9 = vrot.slane %v236_v6, 4  ;;  %v349_v10 = vrot.slane %v348_v7, 4  ;;  %v346_v12 = vmax.f32 %v345_v63, %v226_v3 }
 0x109   :  { %v228_v18 = vmax.f32 %v225_v4, %v227_v11  ;;  %v355_v34 = vsel %vm292_vm4, %v344_v26, -inf  ;;  %v273_v37 = vsel %vm261_vm9, %v272_v36, %v214_v20  ;;  %v390_v3 = vmax.f32 %v207_v19, %v214_v20 }
 0x10a   :  { %v231_v13 = vmax.f32 %v229_v5, %v230_v8  ;;  %v238_v15 = vmax.f32 %v236_v6, %v237_v9  ;;  %v350_v17 = vmax.f32 %v348_v7, %v349_v10  ;;  %v347_v21 = vmax.f32 %v346_v12, %v225_v4 }
 0x10b   :  { %v243_v51 = vsel %vm101_vm1, %v228_v18, -inf  ;;  %v250_v29 = vsel %vm109_vm2, %v228_v18, -inf }
 0x10c   :  { %v232_v27 = vrot.slane %v231_v13, 2  ;;  %v239_v46 = vrot.slane %v238_v15, 2  ;;  %v351_v47 = vrot.slane %v350_v17, 2  ;;  %v244_v23 = vrot.slane %v243_v51, 4 }
 0x10d   :  { %v356_v30 = vsel %vm294_vm5, %v347_v21, -inf  ;;  %v364_v31 = vsel %vm303_vm6, %v347_v21, -inf  ;;  %v251_v35 = vrot.slane %v250_v29, 4 }
 0x10e   :  { %v233_v32 = vmax.f32 %v231_v13, %v232_v27  ;;  %v240_v28 = vmax.f32 %v238_v15, %v239_v46  ;;  %v245_v38 = vmax.f32 %v243_v51, %v244_v23  ;;  %v357_v39 = vmax.f32 %v355_v34, %v356_v30 }
 0x10f   :  { %v365_v24 = vrot.slane %v364_v31, 4  ;;  %v352_v43 = vmax.f32 %v350_v17, %v351_v47  ;;  %v252_v44 = vmax.f32 %v250_v29, %v251_v35 }
 0x110   :  { %v234_v41 = vrot.slane %v233_v32, 1  ;;  %v241_v42 = vrot.slane %v240_v28, 1  ;;  %v246_v45 = vrot.slane %v245_v38, 2  ;;  %v358_v48 = vrot.slane %v357_v39, 4 }
 0x111   :  { %v366_v49 = vmax.f32 %v364_v31, %v365_v24  ;;  %v253_v53 = vrot.slane %v252_v44, 2  ;;  %v353_v58 = vrot.slane %v352_v43, 1 }
 0x112   :  { %v235_v40 = vmax.f32 %v233_v32, %v234_v41  ;;  %v242_v52 = vmax.f32 %v240_v28, %v241_v42  ;;  %v247_v54 = vmax.f32 %v245_v38, %v246_v45  ;;  %v359_v55 = vmax.f32 %v357_v39, %v358_v48 }
 0x113   :  { %v367_v56 = vrot.slane %v366_v49, 2  ;;  %v254_v26 = vmax.f32 %v252_v44, %v253_v53  ;;  %v354_v7 = vmax.f32 %v352_v43, %v353_v58 }
 0x114   :  { %v274_v57 = vsel %vm263_vm10, %v273_v37, %v235_v40  ;;  %v388_v61 = vmax.f32 %v387_v50, %v235_v40  ;;  %v248_v1 = vrot.slane %v247_v54, 1  ;;  %v360_v2 = vrot.slane %v359_v55, 2 }
 0x115   :  { %v275_v0 = vsel %vm265_vm11, %v274_v57, %v242_v52  ;;  %v368_v63 = vmax.f32 %v366_v49, %v367_v56  ;;  %v255_v59 = vrot.slane %v254_v26, 1  ;;  %v376_v62 = vsel %vm267_vm12, %v557_v22, %v354_v7 }
 0x116   :  { %v389_v60 = vmax.f32 %v388_v61, %v242_v52  ;;  %v249_v4 = vmax.f32 %v247_v54, %v248_v1  ;;  %v361_v5 = vmax.f32 %v359_v55, %v360_v2 }
 0x117   :  { %v369_v6 = vrot.slane %v368_v63, 1  ;;  %v256_v8 = vmax.f32 %v254_v26, %v255_v59 }
 0x118   :  { %v276_v9 = vsel %vm267_vm12, %v275_v0, %v249_v4  ;;  %v362_v10 = vrot.slane %v361_v5, 1  ;;  %v391_v12 = vmax.f32 %v390_v3, %v249_v4  ;;  %v398_v15 = vmax.f32 %v397_v14, %v389_v60 }
 0x119   :  { %v370_v11 = vmax.f32 %v368_v63, %v369_v6  ;;  %v277_v13 = vsel %vm269_vm13, %v276_v9, %v256_v8  ;;  %v394_v19 = vsel %vm259_vm8, %v531_v33, %v389_v60 }
 0x11a   :  { %279 = vst.msk [vmem:[%s616_s1 + $0x8] sm:$0xff] %vm86_vm0, %v277_v13  ;;  %v363_v17 = vmax.f32 %v361_v5, %v362_v10  ;;  %v392_v18 = vmax.f32 %v391_v12, %v256_v8 }
 0x11b   :  { %380 = vst.msk [vmem:[%s616_s1 + $0x18] sm:$0x1] %vm379_vm14, %v370_v11 }
 0x11c   :  { %v377_v16 = vsel %vm269_vm13, %v376_v62, %v363_v17  ;;  %v395_v25 = vsel %vm261_vm9, %v394_v19, %v392_v18  ;;  %v399_v14 = vmax.f32 %v398_v15, %v392_v18 }
 0x11d   :  { %378 = vst.msk [vmem:[%s616_s1 + $0x10] sm:$0xff] %vm86_vm0, %v377_v16 }
 0x11e   :  { %396 = vst.msk [vmem:[%s616_s1 + $0x19] sm:$0xf] %vm101_vm1, %v395_v25 }
 0x11f   :  { %400 = vst.msk [vmem:[%s616_s1 + $0x1d] sm:$0x1] %vm379_vm14, %v399_v14 }
 0x120   :  { %405 = vsyncpa [#allocation3], 1 }

</bundles_post_ra>
